<compile_context>
chip_gen: v7x
topology: tpu7x:2x2x1
jax: 0.10.0
libtpu: 0.0.40
codegen_flags: <defaults>
</compile_context>

<pallas_src>
import numpy as np
import jax
import jax.numpy as jnp
from jax import lax
from jax.experimental import pallas as pl
from jax.experimental.pallas import tpu as pltpu

BN_EPS = 1e-5
CONV_CH = 32  # conv1 output channels


def _round_up(x, m):
    return (x + m - 1) // m * m


def _bn_scale_shift(bn_params):
    gamma, beta, mean, var = bn_params
    scale = gamma / jnp.sqrt(var + BN_EPS)
    shift = beta - mean * scale
    return scale, shift


def convlayer_kernel(x_ref, wall_ref, s1_ref, h1_ref, wfc_ref, bfc_ref, out_ref):
    """One batch tile (batch = lane dimension everywhere).

    x_ref   : (Kx, TB)        raw stacked input, rows = cin*H*W + i*W + j, cols = batch.
    wall_ref: (4*S*32, Kx)    scattered conv weight (BN0 folded); row = k*(S*32)+s*32+c.
    s1_ref  : (S*32, 1)       post-pool per-row scale  (BN1 scale, tiled over s).
    h1_ref  : (S*32, 1)       post-pool per-row shift  (BN1 shift + conv-bias term).
    wfc_ref : (D_r, S*32)     fc weight with BN2 folded, cols ordered s*32+c.
    bfc_ref : (D_r, 1)        fc bias with BN2 folded.
    out_ref : (D_r, TB)       lane-dense (transposed) output tile.
    """
    s32 = s1_ref.shape[0]

    # conv1 for all pooled positions and all 4 pool-window offsets in ONE MXU matmul.
    conv = jnp.dot(wall_ref[...], x_ref[...],
                   preferred_element_type=jnp.float32)          # (4*S*32, TB)

    # 2x2 max-pool: elementwise max over the 4 offset row-groups (sublane-aligned).
    p0 = conv[0 * s32:1 * s32]
    p1 = conv[1 * s32:2 * s32]
    p2 = conv[2 * s32:3 * s32]
    p3 = conv[3 * s32:4 * s32]
    pooled = jnp.maximum(jnp.maximum(p0, p1), jnp.maximum(p2, p3))   # (S*32, TB)

    # conv bias + BN1 folded into one affine, then ReLU (f32 epilogue, v5e-safe).
    h = jnp.maximum(pooled * s1_ref[...] + h1_ref[...], 0.0)          # (S*32, TB)
    h = h.astype(wfc_ref.dtype)

    # fc (+ folded BN2) as one MXU matmul with K = S*32, then bias + ReLU.
    y = jnp.dot(wfc_ref[...], h, preferred_element_type=jnp.float32) + bfc_ref[...]
    out_ref[...] = jnp.maximum(y, 0.0)


def conv_layer_forward(e1, rel, params, *, batch_tile=256,
                       compute_dtype=jnp.float32):
    ent_emb = params["entity_embedding"]
    rel_emb = params["relation_embedding"]
    emb_dim1 = params["emb_dim1"]

    B = e1.shape[0]
    D = ent_emb.shape[1]
    H, W = emb_dim1, D // emb_dim1
    assert H * W == D, "embedding_dim must equal emb_dim1 * emb_dim2"
    assert H >= 3 and W >= 3, "spatial dims too small for a 3x3 conv"
    Ho, Wo = H - 2, W - 2
    PH, PW = Ho // 2, Wo // 2            # floor-mode pooling (matches MaxPool2d(2,2))
    assert PH >= 1 and PW >= 1, "conv output too small for 2x2 max pool"
    S = PH * PW
    Khid = S * CONV_CH                   # fc contraction length
    M1 = 4 * Khid                        # conv-matmul output rows (4 pool offsets)
    Kx = _round_up(2 * H * W, 8)         # conv-matmul contraction length (sublane pad)
    D_r = _round_up(D, 8)                # output rows (sublane pad)

    # ---- batch tiling: batch is the lane dim of every block ----
    B8 = _round_up(B, 8)
    if B8 <= batch_tile:
        TB = B8                          # single tile, block == full dim (no 128 req.)
    else:
        TB = _round_up(min(batch_tile, B8), 128)
    B_pad = _round_up(B8, TB)
    n_tiles = B_pad // TB

    # ---- host glue: embedding gather, stack, transpose to (Kx, B_pad) ----
    x2d = jnp.concatenate([ent_emb[e1], rel_emb[rel]], axis=1).astype(jnp.float32)
    X = jnp.pad(x2d.T, ((0, Kx - 2 * H * W), (0, B_pad - B))).astype(compute_dtype)

    # ---- fold BN0 into conv weight; build scattered conv+pool weight Wall ----
    sc0, sh0 = _bn_scale_shift(params["bn0"])                 # per input channel (2,)
    conv_w = params["conv_w"]                                 # (32, 2, 3, 3)
    w_eff = conv_w * sc0[None, :, None, None]
    bc_total = params["conv_b"] + jnp.einsum("oikl,i->o", conv_w, sh0)  # per out ch.

    kk, ss, qq, tt = [], [], [], []
    for wi in range(2):
        for wj in range(2):
            k = wi * 2 + wj
            for ph in range(PH):
                for pw in range(PW):
                    s = ph * PW + pw
                    for cin in range(2):
                        for kh in range(3):
                            for kw in range(3):
                                q = (cin * H * W
                                     + (2 * ph + wi + kh) * W
                                     + (2 * pw + wj + kw))
                                kk.append(k); ss.append(s); qq.append(q)
                                tt.append(cin * 9 + kh * 3 + kw)
    kk = np.asarray(kk, np.int32); ss = np.asarray(ss, np.int32)
    qq = np.asarray(qq, np.int32); tt = np.asarray(tt, np.int32)

    w_taps = w_eff.transpose(1, 2, 3, 0).reshape(18, CONV_CH)       # (18, 32)
    vals = w_taps[tt]                                               # (L, 32)
    canvas = jnp.zeros((4, S, Kx, CONV_CH), jnp.float32).at[kk, ss, qq].set(vals)
    Wall = canvas.transpose(0, 1, 3, 2).reshape(M1, Kx).astype(compute_dtype)

    # ---- post-pool affine (BN1 + conv bias), rows ordered s*32 + c ----
    sc1, sh1 = _bn_scale_shift(params["bn1"])
    s1_rows = jnp.tile(sc1, S)[:, None].astype(jnp.float32)          # (Khid, 1)
    h1_rows = jnp.tile(sh1 + sc1 * bc_total, S)[:, None].astype(jnp.float32)

    # ---- fc weight with BN2 folded; cols reordered (c*S+s) -> (s*32+c) ----
    sc2, sh2 = _bn_scale_shift(params["bn2"])
    wfcT = params["fc_w"].reshape(D, CONV_CH, S).transpose(0, 2, 1).reshape(D, Khid)
    wfcT = wfcT * sc2[:, None]
    bfc = (params["fc_b"] * sc2 + sh2)[:, None]
    if D_r > D:
        wfcT = jnp.pad(wfcT, ((0, D_r - D), (0, 0)))
        bfc = jnp.pad(bfc, ((0, D_r - D), (0, 0)))
    wfcT = wfcT.astype(compute_dtype)
    bfc = bfc.astype(jnp.float32)

    # ---- VMEM budget derived from shapes (double-buffered blocks + temporaries) ----
    itb = jnp.dtype(compute_dtype).itemsize
    lane = lambda n: _round_up(n, 128)
    vmem_est = (2 * Kx * lane(TB) * itb            # X blocks
                + 2 * M1 * lane(Kx) * itb          # Wall
                + 2 * D_r * lane(Khid) * itb       # wfcT
                + 2 * (2 * Khid + D_r) * 128 * 4   # s1/h1/bfc
                + 2 * D_r * lane(TB) * 4           # out blocks
                + (2 * M1 + 3 * Khid) * lane(TB) * 4)   # matmul/pool temporaries
    vmem_limit = int(min(max(vmem_est * 3 // 2, 32 << 20), 96 << 20))

    out = pl.pallas_call(
        convlayer_kernel,
        out_shape=jax.ShapeDtypeStruct((D_r, B_pad), jnp.float32),
        grid=(n_tiles,),
        in_specs=[
            pl.BlockSpec((Kx, TB), lambda t: (0, t)),        # raw input, batch in lanes
            pl.BlockSpec((M1, Kx), lambda t: (0, 0)),        # scattered conv+pool weight
            pl.BlockSpec((Khid, 1), lambda t: (0, 0)),       # post-pool scale
            pl.BlockSpec((Khid, 1), lambda t: (0, 0)),       # post-pool shift
            pl.BlockSpec((D_r, Khid), lambda t: (0, 0)),     # fc weight (BN2 folded)
            pl.BlockSpec((D_r, 1), lambda t: (0, 0)),        # fc bias
        ],
        out_specs=pl.BlockSpec((D_r, TB), lambda t: (0, t)),
        compiler_params=pltpu.CompilerParams(
            dimension_semantics=("parallel",),               # shards tiles over v7x TCs
            vmem_limit_bytes=vmem_limit),
    )(X, Wall, s1_rows, h1_rows, wfcT, bfc)

    return out[:D, :B].T


def reference_forward(e1, rel, params):
    """Pure-JAX (inference-mode) reference matching the PyTorch module."""
    ent_emb = params["entity_embedding"]
    rel_emb = params["relation_embedding"]
    emb_dim1 = params["emb_dim1"]
    B = e1.shape[0]
    D = ent_emb.shape[1]
    emb_dim2 = D // emb_dim1

    def bn(x, p, axis):
        g, b, m, v = p
        shp = [1] * x.ndim
        shp[axis] = -1
        return ((x - m.reshape(shp)) / jnp.sqrt(v.reshape(shp) + BN_EPS)
                * g.reshape(shp) + b.reshape(shp))

    x = jnp.concatenate([ent_emb[e1].reshape(B, 1, emb_dim1, emb_dim2),
                         rel_emb[rel].reshape(B, 1, emb_dim1, emb_dim2)], axis=1)
    x = bn(x, params["bn0"], 1)
    x = lax.conv_general_dilated(x, params["conv_w"], (1, 1), "VALID",
                                 dimension_numbers=("NCHW", "OIHW", "NCHW"))
    x = x + params["conv_b"][None, :, None, None]
    x = lax.reduce_window(x, -jnp.inf, lax.max, (1, 1, 2, 2), (1, 1, 2, 2), "VALID")
    x = bn(x, params["bn1"], 1)
    x = jnp.maximum(x, 0.0)
    x = x.reshape(B, -1)
    x = x @ params["fc_w"].T + params["fc_b"]
    x = bn(x, params["bn2"], 1)
    return jnp.maximum(x, 0.0)


if __name__ == "__main__":
    key = jax.random.PRNGKey(0)
    keys = jax.random.split(key, 12)

    # small shapes consistent with the module
    nentity, nrelation = 10, 5
    emb_dim = 32                # embedding_dim
    emb_dim1 = 8                # -> emb_dim2 = 4
    emb_dim2 = emb_dim // emb_dim1
    B = 2
    PH, PW = (emb_dim1 - 2) // 2, (emb_dim2 - 2) // 2
    hidden_size = CONV_CH * PH * PW   # 32*3*1 = 96

    params = {
        "emb_dim1": emb_dim1,
        "entity_embedding": 0.1 * jax.random.normal(keys[0], (nentity, emb_dim), jnp.float32),
        "relation_embedding": 0.1 * jax.random.normal(keys[1], (nrelation, emb_dim), jnp.float32),
        "conv_w": 0.1 * jax.random.normal(keys[2], (CONV_CH, 2, 3, 3), jnp.float32),
        "conv_b": 0.1 * jax.random.normal(keys[3], (CONV_CH,), jnp.float32),
        "fc_w": 0.1 * jax.random.normal(keys[4], (emb_dim, hidden_size), jnp.float32),
        "fc_b": 0.1 * jax.random.normal(keys[5], (emb_dim,), jnp.float32),
        # BatchNorm: (gamma, beta, running_mean, running_var)
        "bn0": (1.0 + 0.1 * jax.random.normal(keys[6], (2,), jnp.float32),
                0.1 * jax.random.normal(keys[7], (2,), jnp.float32),
                jnp.zeros((2,), jnp.float32), jnp.ones((2,), jnp.float32)),
        "bn1": (1.0 + 0.1 * jax.random.normal(keys[8], (CONV_CH,), jnp.float32),
                0.1 * jax.random.normal(keys[9], (CONV_CH,), jnp.float32),
                jnp.zeros((CONV_CH,), jnp.float32), jnp.ones((CONV_CH,), jnp.float32)),
        "bn2": (1.0 + 0.1 * jax.random.normal(keys[10], (emb_dim,), jnp.float32),
                0.1 * jax.random.normal(keys[11], (emb_dim,), jnp.float32),
                jnp.zeros((emb_dim,), jnp.float32), jnp.ones((emb_dim,), jnp.float32)),
    }

    e1 = jnp.array([1, 3], dtype=jnp.int32)
    rel = jnp.array([0, 2], dtype=jnp.int32)

    ref = reference_forward(e1, rel, params)

    # f32 path: exact-mode check
    out = jax.block_until_ready(conv_layer_forward(e1, rel, params))
    assert out.shape == (B, emb_dim) and out.dtype == jnp.float32
    assert np.allclose(np.asarray(out), np.asarray(ref), atol=1e-4, rtol=1e-4), \
        f"f32 mismatch: max abs diff {np.max(np.abs(np.asarray(out) - np.asarray(ref)))}"

    # bf16-operand path (f32 accumulation): halves the dominant HBM/VMEM streams
    out_bf = jax.block_until_ready(
        conv_layer_forward(e1, rel, params, compute_dtype=jnp.bfloat16))
    assert out_bf.shape == (B, emb_dim)
    assert np.allclose(np.asarray(out_bf), np.asarray(ref), atol=3e-2, rtol=3e-2), \
        f"bf16 mismatch: max abs diff {np.max(np.abs(np.asarray(out_bf) - np.asarray(ref)))}"

    print("KERNEL_OK")
</pallas_src>

<mosaic_0001>
module attributes {stable_mosaic.version = 11 : i64} {
  func.func @convlayer_kernel(%arg0: i32, %arg1: memref<64x8xf32, #tpu.memory_space<vmem>>, %arg2: memref<384x64xf32, #tpu.memory_space<vmem>>, %arg3: memref<96x1xf32, #tpu.memory_space<vmem>>, %arg4: memref<96x1xf32, #tpu.memory_space<vmem>>, %arg5: memref<32x96xf32, #tpu.memory_space<vmem>>, %arg6: memref<32x1xf32, #tpu.memory_space<vmem>>, %arg7: memref<32x8xf32, #tpu.memory_space<vmem>>) attributes {dimension_semantics = [#tpu.dimension_semantics<parallel>], iteration_bounds = array<i64: 1>, scalar_prefetch = 0 : i64, scratch_operands = 0 : i64, tpu.core_type = #tpu.core_type<tc>, window_params = [{transform_indices = @transform_0, window_bounds = array<i64: 64, 8>}, {pipeline_mode = #tpu.pipeline_mode<synchronous>, transform_indices = @transform_1, window_bounds = array<i64: 384, 64>}, {pipeline_mode = #tpu.pipeline_mode<synchronous>, transform_indices = @transform_2, window_bounds = array<i64: 96, 1>}, {pipeline_mode = #tpu.pipeline_mode<synchronous>, transform_indices = @transform_3, window_bounds = array<i64: 96, 1>}, {pipeline_mode = #tpu.pipeline_mode<synchronous>, transform_indices = @transform_4, window_bounds = array<i64: 32, 96>}, {pipeline_mode = #tpu.pipeline_mode<synchronous>, transform_indices = @transform_5, window_bounds = array<i64: 32, 1>}, {transform_indices = @transform_6, window_bounds = array<i64: 32, 8>}]} {
    %c0 = arith.constant 0 : index
    %c0_0 = arith.constant 0 : index
    %0 = vector.load %arg2[%c0, %c0_0] : memref<384x64xf32, #tpu.memory_space<vmem>>, vector<384x64xf32>
    %c0_1 = arith.constant 0 : index
    %c0_2 = arith.constant 0 : index
    %1 = vector.load %arg1[%c0_1, %c0_2] : memref<64x8xf32, #tpu.memory_space<vmem>>, vector<64x8xf32>
    %cst = arith.constant dense<0.000000e+00> : vector<384x8xf32>
    %2 = tpu.matmul %0, %1, %cst {dimension_numbers = #tpu.dot_dimension_numbers<[1], [0], [0], [1], [0, 0, 1, 1], [], []>} : vector<384x64xf32>, vector<64x8xf32>, vector<384x8xf32> -> vector<384x8xf32>
    %3 = vector.extract_strided_slice %2 {offsets = [0, 0], sizes = [96, 8], strides = [1, 1]} : vector<384x8xf32> to vector<96x8xf32>
    %4 = vector.extract_strided_slice %2 {offsets = [96, 0], sizes = [96, 8], strides = [1, 1]} : vector<384x8xf32> to vector<96x8xf32>
    %5 = vector.extract_strided_slice %2 {offsets = [192, 0], sizes = [96, 8], strides = [1, 1]} : vector<384x8xf32> to vector<96x8xf32>
    %6 = vector.extract_strided_slice %2 {offsets = [288, 0], sizes = [96, 8], strides = [1, 1]} : vector<384x8xf32> to vector<96x8xf32>
    %7 = arith.maximumf %3, %4 : vector<96x8xf32>
    %8 = arith.maximumf %5, %6 : vector<96x8xf32>
    %9 = arith.maximumf %7, %8 : vector<96x8xf32>
    %c0_3 = arith.constant 0 : index
    %c0_4 = arith.constant 0 : index
    %10 = vector.load %arg3[%c0_3, %c0_4] : memref<96x1xf32, #tpu.memory_space<vmem>>, vector<96x1xf32>
    %11 = vector.broadcast %10 : vector<96x1xf32> to vector<96x8xf32>
    %12 = arith.mulf %9, %11 : vector<96x8xf32>
    %c0_5 = arith.constant 0 : index
    %c0_6 = arith.constant 0 : index
    %13 = vector.load %arg4[%c0_5, %c0_6] : memref<96x1xf32, #tpu.memory_space<vmem>>, vector<96x1xf32>
    %14 = vector.broadcast %13 : vector<96x1xf32> to vector<96x8xf32>
    %15 = arith.addf %12, %14 : vector<96x8xf32>
    %cst_7 = arith.constant 0.000000e+00 : f32
    %16 = vector.broadcast %cst_7 : f32 to vector<96x8xf32>
    %17 = arith.maximumf %15, %16 : vector<96x8xf32>
    %c0_8 = arith.constant 0 : index
    %c0_9 = arith.constant 0 : index
    %18 = vector.load %arg5[%c0_8, %c0_9] : memref<32x96xf32, #tpu.memory_space<vmem>>, vector<32x96xf32>
    %cst_10 = arith.constant dense<0.000000e+00> : vector<32x8xf32>
    %19 = tpu.matmul %18, %17, %cst_10 {dimension_numbers = #tpu.dot_dimension_numbers<[1], [0], [0], [1], [0, 0, 1, 1], [], []>} : vector<32x96xf32>, vector<96x8xf32>, vector<32x8xf32> -> vector<32x8xf32>
    %c0_11 = arith.constant 0 : index
    %c0_12 = arith.constant 0 : index
    %20 = vector.load %arg6[%c0_11, %c0_12] : memref<32x1xf32, #tpu.memory_space<vmem>>, vector<32x1xf32>
    %21 = vector.broadcast %20 : vector<32x1xf32> to vector<32x8xf32>
    %22 = arith.addf %19, %21 : vector<32x8xf32>
    %cst_13 = arith.constant 0.000000e+00 : f32
    %23 = vector.broadcast %cst_13 : f32 to vector<32x8xf32>
    %24 = arith.maximumf %22, %23 : vector<32x8xf32>
    %c0_14 = arith.constant 0 : index
    %c0_15 = arith.constant 0 : index
    %25 = vector.load %arg7[%c0_14, %c0_15] : memref<32x8xf32, #tpu.memory_space<vmem>>, vector<32x8xf32>
    tpu.vector_store %arg7[%c0_14, %c0_15], %24 {strides = array<i32>} : memref<32x8xf32, #tpu.memory_space<vmem>>, vector<32x8xf32>,
    return
  }
  func.func @transform_0(%arg0: i32) -> (i32, i32) {
    %c0_i32 = arith.constant 0 : i32
    %c0_i32_0 = arith.constant 0 : i32
    return %c0_i32, %arg0 : i32, i32
  }
  func.func @transform_1(%arg0: i32) -> (i32, i32) {
    %c0_i32 = arith.constant 0 : i32
    %c0_i32_0 = arith.constant 0 : i32
    %c0_i32_1 = arith.constant 0 : i32
    return %c0_i32, %c0_i32_0 : i32, i32
  }
  func.func @transform_2(%arg0: i32) -> (i32, i32) {
    %c0_i32 = arith.constant 0 : i32
    %c0_i32_0 = arith.constant 0 : i32
    %c0_i32_1 = arith.constant 0 : i32
    return %c0_i32, %c0_i32_0 : i32, i32
  }
  func.func @transform_3(%arg0: i32) -> (i32, i32) {
    %c0_i32 = arith.constant 0 : i32
    %c0_i32_0 = arith.constant 0 : i32
    %c0_i32_1 = arith.constant 0 : i32
    return %c0_i32, %c0_i32_0 : i32, i32
  }
  func.func @transform_4(%arg0: i32) -> (i32, i32) {
    %c0_i32 = arith.constant 0 : i32
    %c0_i32_0 = arith.constant 0 : i32
    %c0_i32_1 = arith.constant 0 : i32
    return %c0_i32, %c0_i32_0 : i32, i32
  }
  func.func @transform_5(%arg0: i32) -> (i32, i32) {
    %c0_i32 = arith.constant 0 : i32
    %c0_i32_0 = arith.constant 0 : i32
    %c0_i32_1 = arith.constant 0 : i32
    return %c0_i32, %c0_i32_0 : i32, i32
  }
  func.func @transform_6(%arg0: i32) -> (i32, i32) {
    %c0_i32 = arith.constant 0 : i32
    %c0_i32_0 = arith.constant 0 : i32
    return %c0_i32, %arg0 : i32, i32
  }
}

</mosaic_0001>

<bundles_post_ra>
// kernel: tpu_custom_call.1
= control target key start
LH: loop header
LB: loop body
LE: loop exit
PB: predicated region body
PF: predicated region fallthrough
CT: control target
= control target key end

     0   :  { %v1177_v3 = vmov 0   ;;  %vm79_vm0 = vcmask 523264   ;;  %vm773_vm1 = vcmask 785408   ;;  %vm875_vm2 = vcmask 64512   ;;  %s1643_s0 = inlined_call_operand.vmem [shape: f32[64,8], index: 0, kind: input, shape index: {}]   ;;  %s1644_s1 = inlined_call_operand.vmem [shape: f32[384,64], index: 1, kind: input, shape index: {}]   ;;  %s1645_s3 = inlined_call_operand.vmem [shape: f32[96,1], index: 3, kind: input, shape index: {}]   ;;  %s1646_s2 = inlined_call_operand.vmem [shape: f32[96,1], index: 2, kind: input, shape index: {}]   ;;  %s1647_s5 = inlined_call_operand.vmem [shape: f32[32,1], index: 5, kind: input, shape index: {}]   ;;  %s1648_s4 = inlined_call_operand.vmem [shape: f32[32,96], index: 4, kind: input, shape index: {}]   ;;  %s1649_s6 = inlined_call_operand.vmem [shape: f32[32,8], index: 6, kind: output, shape index: {}]  }
   0x1   :  { %v71_v0 = vld [vmem:[%s1643_s0] sm:$0xff]  ;;  %v72_v1 = vld [vmem:[%s1643_s0 + $0x8] sm:$0xff]  ;;  %v73_v2 = vld [vmem:[%s1643_s0 + $0x10] sm:$0xff]  ;;  %1176 = vset.pattern.permute.xlu1 %v1177_v3  ;;  %1175 = vset.pattern.permute.xlu0 %v1177_v3 }
   0x2   :  { %v1126_v4 = vpack.c.bf16 %v72_v1, %v71_v0  ;;  %v74_v5 = vld [vmem:[%s1643_s0 + $0x18] sm:$0xff]  ;;  %v75_v7 = vld [vmem:[%s1643_s0 + $0x20] sm:$0xff]  ;;  %v76_v8 = vld [vmem:[%s1643_s0 + $0x28] sm:$0xff] }
   0x3   :  { %v1130_v6 = vpack.c.bf16 %v74_v5, %v73_v2  ;;  %v23_v9 = vld [vmem:[%s1644_s1] sm:$0xff]  ;;  %v49_v10 = vld [vmem:[%s1644_s1 + $0xd0] sm:$0xff]  ;;  %v1134_v11 = vpack.c.bf16 %v76_v8, %v75_v7  ;;  %v78_v13 = vld [vmem:[%s1643_s0 + $0x38] sm:$0xff] }
   0x4   :  { %1127 = vmatprep.subr.bf16.mxu0 %v1126_v4  ;;  %1166 = vmatprep.subr.bf16.mxu1 %v1126_v4  ;;  %v77_v12 = vld [vmem:[%s1643_s0 + $0x30] sm:$0xff]  ;;  %v24_v15 = vld [vmem:[%s1644_s1 + $0x8] sm:$0xff]  ;;  %v50_v16 = vld [vmem:[%s1644_s1 + $0xd8] sm:$0xff] }
   0x5   :  { %1129 = vmatpush3.bf16.msra.mxu0 %v1126_v4  ;;  %1170 = vmatpush3.bf16.msra.mxu1 %v1126_v4  ;;  %v1138_v14 = vpack.c.bf16 %v78_v13, %v77_v12  ;;  %v25_v17 = vld [vmem:[%s1644_s1 + $0x10] sm:$0xff]  ;;  %v51_v18 = vld [vmem:[%s1644_s1 + $0xe0] sm:$0xff]  ;;  %v26_v21 = vld [vmem:[%s1644_s1 + $0x18] sm:$0xff] }
   0x6   :  { %1131 = vmatprep.subr.bf16.mxu0 %v1130_v6  ;;  %1167 = vmatprep.subr.bf16.mxu1 %v1130_v6  ;;  %v649_v19 = vld [vmem:[%s1645_s3] sm:$0xff]  ;;  %v52_v22 = vld [vmem:[%s1644_s1 + $0xe8] sm:$0xff]  ;;  %v53_v24 = vld [vmem:[%s1644_s1 + $0xf0] sm:$0xff] }
   0x7   :  { %1024 = vmatprep.mubr.msk.f32.mxu0 %vm79_vm0, %v23_v9  ;;  %1063 = vmatprep.mubr.msk.f32.mxu1 %vm79_vm0, %v49_v10  ;;  %v565_v20 = vld [vmem:[%s1646_s2] sm:$0xff]  ;;  %v650_v25 = vld [vmem:[%s1645_s3 + $0x8] sm:$0xff]  ;;  %v54_v28 = vld [vmem:[%s1644_s1 + $0xf8] sm:$0xff] }
   0x8   :  { %v27_v23 = vld [vmem:[%s1644_s1 + $0x20] sm:$0xff]  ;;  %663 = vperm.xlu1 %1176, %v649_v19   ;;  %579 = vperm.xlu0 %1175, %v565_v20   ;;  %v566_v26 = vld [vmem:[%s1646_s2 + $0x8] sm:$0xff]  ;;  %v29_v29 = vld [vmem:[%s1644_s1 + $0x30] sm:$0xff] }
   0x9   :  { %1133 = vmatpush3.bf16.msra.mxu0 %v1130_v6  ;;  %1171 = vmatpush3.bf16.msra.mxu1 %v1130_v6  ;;  %v28_v27 = vld [vmem:[%s1644_s1 + $0x28] sm:$0xff]  ;;  %v55_v30 = vld [vmem:[%s1644_s1 + $0x100] sm:$0xff]  ;;  %v568_v31 = vld [vmem:[%s1646_s2 + $0x18] sm:$0xff] }
   0xa   :  { %1135 = vmatprep.subr.bf16.mxu0 %v1134_v11  ;;  %1168 = vmatprep.subr.bf16.mxu1 %v1134_v11  ;;  %v567_v32 = vld [vmem:[%s1646_s2 + $0x10] sm:$0xff]  ;;  %v30_v33 = vld [vmem:[%s1644_s1 + $0x38] sm:$0xff]  ;;  %v56_v34 = vld [vmem:[%s1644_s1 + $0x108] sm:$0xff] }
   0xb   :  { %v31_v35 = vld [vmem:[%s1644_s1 + $0x40] sm:$0xff]  ;;  %v57_v36 = vld [vmem:[%s1644_s1 + $0x110] sm:$0xff]  ;;  %v652_v37 = vld [vmem:[%s1645_s3 + $0x18] sm:$0xff] }
   0xc   :  { %668 = vperm.xlu1 %1176, %v650_v25   ;;  %584 = vperm.xlu0 %1175, %v566_v26   ;;  %v651_v38 = vld [vmem:[%s1645_s3 + $0x10] sm:$0xff]  ;;  %v32_v39 = vld [vmem:[%s1644_s1 + $0x48] sm:$0xff]  ;;  %v58_v40 = vld [vmem:[%s1644_s1 + $0x118] sm:$0xff] }
   0xd   :  { %1137 = vmatpush3.bf16.msra.mxu0 %v1134_v11  ;;  %1172 = vmatpush3.bf16.msra.mxu1 %v1134_v11  ;;  %v33_v41 = vld [vmem:[%s1644_s1 + $0x50] sm:$0xff]  ;;  %v59_v42 = vld [vmem:[%s1644_s1 + $0x120] sm:$0xff]  ;;  %v570_v43 = vld [vmem:[%s1646_s2 + $0x28] sm:$0xff] }
   0xe   :  { %1139 = vmatprep.subr.bf16.mxu0 %v1138_v14  ;;  %1169 = vmatprep.subr.bf16.mxu1 %v1138_v14  ;;  %v569_v44 = vld [vmem:[%s1646_s2 + $0x20] sm:$0xff]  ;;  %v34_v45 = vld [vmem:[%s1644_s1 + $0x58] sm:$0xff]  ;;  %v60_v46 = vld [vmem:[%s1644_s1 + $0x128] sm:$0xff] }
   0xf   :  { %v35_v47 = vld [vmem:[%s1644_s1 + $0x60] sm:$0xff]  ;;  %v61_v48 = vld [vmem:[%s1644_s1 + $0x130] sm:$0xff]  ;;  %v654_v49 = vld [vmem:[%s1645_s3 + $0x28] sm:$0xff] }
  0x10   :  { %594 = vperm.xlu1 %1176, %v568_v31   ;;  %589 = vperm.xlu0 %1175, %v567_v32   ;;  %v653_v50 = vld [vmem:[%s1645_s3 + $0x20] sm:$0xff]  ;;  %v36_v51 = vld [vmem:[%s1644_s1 + $0x68] sm:$0xff]  ;;  %v62_v52 = vld [vmem:[%s1644_s1 + $0x138] sm:$0xff] }
  0x11   :  { %1141 = vmatpush3.bf16.msra.mxu0 %v1138_v14  ;;  %1173 = vmatpush3.bf16.msra.mxu1 %v1138_v14  ;;  %v37_v53 = vld [vmem:[%s1644_s1 + $0x70] sm:$0xff]  ;;  %v63_v54 = vld [vmem:[%s1644_s1 + $0x140] sm:$0xff]  ;;  %v572_v55 = vld [vmem:[%s1646_s2 + $0x38] sm:$0xff] }
  0x12   :  { %v571_v56 = vld [vmem:[%s1646_s2 + $0x30] sm:$0xff]  ;;  %v38_v57 = vld [vmem:[%s1644_s1 + $0x78] sm:$0xff]  ;;  %v64_v58 = vld [vmem:[%s1644_s1 + $0x148] sm:$0xff] }
  0x13   :  { %v39_v59 = vld [vmem:[%s1644_s1 + $0x80] sm:$0xff]  ;;  %v65_v60 = vld [vmem:[%s1644_s1 + $0x150] sm:$0xff]  ;;  %v656_v61 = vld [vmem:[%s1645_s3 + $0x38] sm:$0xff] }
  0x14   :  { %1025 = vmatmul.mubr.msk.f32.vlgmr.msra.gmra.mrb[0].mxu0 %vm79_vm0, %v24_v15  ;;  %1064 = vmatmul.mubr.msk.f32.vlgmr.msra.gmra.mrb[0].mxu1 %vm79_vm0, %v50_v16  ;;  %v655_v62 = vld [vmem:[%s1645_s3 + $0x30] sm:$0xff]  ;;  %v40_v63 = vld [vmem:[%s1644_s1 + $0x88] sm:$0xff]  ;;  %v66_v0 = vld [vmem:[%s1644_s1 + $0x158] sm:$0xff] }
  0x15   :  { %1027 = vmatprep.mubr.msk.f32.mxu0 %vm79_vm0, %v25_v17  ;;  %1066 = vmatprep.mubr.msk.f32.mxu1 %vm79_vm0, %v51_v18  ;;  %v41_v1 = vld [vmem:[%s1644_s1 + $0x90] sm:$0xff]  ;;  %v67_v2 = vld [vmem:[%s1644_s1 + $0x160] sm:$0xff]  ;;  %v574_v3 = vld [vmem:[%s1646_s2 + $0x48] sm:$0xff] }
  0x16   :  { %678 = vperm.xlu1 %1176, %v652_v37   ;;  %673 = vperm.xlu0 %1175, %v651_v38   ;;  %v573_v4 = vld [vmem:[%s1646_s2 + $0x40] sm:$0xff]  ;;  %v42_v5 = vld [vmem:[%s1644_s1 + $0x98] sm:$0xff]  ;;  %v68_v6 = vld [vmem:[%s1644_s1 + $0x168] sm:$0xff] }
  0x17   :  { %v43_v7 = vld [vmem:[%s1644_s1 + $0xa0] sm:$0xff]  ;;  %v69_v8 = vld [vmem:[%s1644_s1 + $0x170] sm:$0xff]  ;;  %v658_v9 = vld [vmem:[%s1645_s3 + $0x48] sm:$0xff] }
  0x18   :  { %1028 = vmatmul.mubr.msk.f32.gmra.mrb[2].mxu0 %vm79_vm0, %v26_v21  ;;  %1067 = vmatmul.mubr.msk.f32.gmra.mrb[2].mxu1 %vm79_vm0, %v52_v22  ;;  %v657_v10 = vld [vmem:[%s1645_s3 + $0x40] sm:$0xff]  ;;  %v44_v11 = vld [vmem:[%s1644_s1 + $0xa8] sm:$0xff]  ;;  %v70_v12 = vld [vmem:[%s1644_s1 + $0x178] sm:$0xff] }
  0x19   :  { %1030 = vmatprep.mubr.msk.f32.mxu0 %vm79_vm0, %v27_v23  ;;  %1069 = vmatprep.mubr.msk.f32.mxu1 %vm79_vm0, %v53_v24  ;;  %v45_v13 = vld [vmem:[%s1644_s1 + $0xb0] sm:$0xff]  ;;  %v576_v14 = vld [vmem:[%s1646_s2 + $0x58] sm:$0xff]  ;;  %v47_v17 = vld [vmem:[%s1644_s1 + $0xc0] sm:$0xff] }
  0x1a   :  { %604 = vperm.xlu1 %1176, %v570_v43   ;;  %599 = vperm.xlu0 %1175, %v569_v44   ;;  %v575_v15 = vld [vmem:[%s1646_s2 + $0x50] sm:$0xff]  ;;  %v46_v16 = vld [vmem:[%s1644_s1 + $0xb8] sm:$0xff]  ;;  %v48_v20 = vld [vmem:[%s1644_s1 + $0xc8] sm:$0xff] }
  0x1b   :  { %v660_v18 = vld [vmem:[%s1645_s3 + $0x58] sm:$0xff]  ;;  %v659_v19 = vld [vmem:[%s1645_s3 + $0x50] sm:$0xff]  ;;  %v750_v21 = vld [vmem:[%s1647_s5 + $0x8] sm:$0xff] }
  0x1c   :  { %1031 = vmatmul.mubr.msk.f32.gmra.mrb[4].mxu0 %vm79_vm0, %v28_v27  ;;  %1070 = vmatmul.mubr.msk.f32.gmra.mrb[4].mxu1 %vm79_vm0, %v54_v28  ;;  %v749_v22 = vld [vmem:[%s1647_s5] sm:$0xff]  ;;  %v752_v23 = vld [vmem:[%s1647_s5 + $0x18] sm:$0xff]  ;;  %v751_v24 = vld [vmem:[%s1647_s5 + $0x10] sm:$0xff] }
  0x1d   :  { %1033 = vmatprep.mubr.msk.f32.mxu0 %vm79_vm0, %v29_v29  ;;  %1072 = vmatprep.mubr.msk.f32.mxu1 %vm79_vm0, %v55_v30  ;;  %v745_v25 = vld [vmem:[%s1648_s4] sm:$0xff] }
  0x1e   :  { %688 = vperm.xlu1 %1176, %v654_v49   ;;  %683 = vperm.xlu0 %1175, %v653_v50  }
  0x20   :  { %1034 = vmatmul.mubr.msk.f32.gmra.mrb[6].mxu0 %vm79_vm0, %v30_v33  ;;  %1073 = vmatmul.mubr.msk.f32.gmra.mrb[6].mxu1 %vm79_vm0, %v56_v34 }
  0x21   :  { %1036 = vmatprep.mubr.msk.f32.mxu0 %vm79_vm0, %v31_v35  ;;  %1075 = vmatprep.mubr.msk.f32.mxu1 %vm79_vm0, %v57_v36 }
  0x22   :  { %614 = vperm.xlu1 %1176, %v572_v55   ;;  %609 = vperm.xlu0 %1175, %v571_v56  }
  0x24   :  { %1037 = vmatmul.mubr.msk.f32.gmra.mrb[8].mxu0 %vm79_vm0, %v32_v39  ;;  %1076 = vmatmul.mubr.msk.f32.gmra.mrb[8].mxu1 %vm79_vm0, %v58_v40 }
  0x25   :  { %1039 = vmatprep.mubr.msk.f32.mxu0 %vm79_vm0, %v33_v41  ;;  %1078 = vmatprep.mubr.msk.f32.mxu1 %vm79_vm0, %v59_v42 }
  0x26   :  { %698 = vperm.xlu1 %1176, %v656_v61   ;;  %693 = vperm.xlu0 %1175, %v655_v62  }
  0x28   :  { %1040 = vmatmul.mubr.msk.f32.gmra.mrb[10].mxu0 %vm79_vm0, %v34_v45  ;;  %1079 = vmatmul.mubr.msk.f32.gmra.mrb[10].mxu1 %vm79_vm0, %v60_v46 }
  0x29   :  { %1042 = vmatprep.mubr.msk.f32.mxu0 %vm79_vm0, %v35_v47  ;;  %1081 = vmatprep.mubr.msk.f32.mxu1 %vm79_vm0, %v61_v48 }
  0x2a   :  { %624 = vperm.xlu1 %1176, %v574_v3   ;;  %619 = vperm.xlu0 %1175, %v573_v4  }
  0x2c   :  { %1043 = vmatmul.mubr.msk.f32.gmra.mrb[12].mxu0 %vm79_vm0, %v36_v51  ;;  %1082 = vmatmul.mubr.msk.f32.gmra.mrb[12].mxu1 %vm79_vm0, %v62_v52 }
  0x2d   :  { %1045 = vmatprep.mubr.msk.f32.mxu0 %vm79_vm0, %v37_v53  ;;  %1084 = vmatprep.mubr.msk.f32.mxu1 %vm79_vm0, %v63_v54 }
  0x2e   :  { %708 = vperm.xlu1 %1176, %v658_v9   ;;  %703 = vperm.xlu0 %1175, %v657_v10  }
  0x30   :  { %1046 = vmatmul.mubr.msk.f32.gmra.mrb[14].mxu0 %vm79_vm0, %v38_v57  ;;  %1085 = vmatmul.mubr.msk.f32.gmra.mrb[14].mxu1 %vm79_vm0, %v64_v58 }
  0x31   :  { %1048 = vmatprep.mubr.msk.f32.mxu0 %vm79_vm0, %v39_v59  ;;  %1087 = vmatprep.mubr.msk.f32.mxu1 %vm79_vm0, %v65_v60 }
  0x32   :  { %634 = vperm.xlu1 %1176, %v576_v14   ;;  %629 = vperm.xlu0 %1175, %v575_v15  }
  0x34   :  { %1049 = vmatmul.mubr.msk.f32.gmra.mrb[16].mxu0 %vm79_vm0, %v40_v63  ;;  %1088 = vmatmul.mubr.msk.f32.gmra.mrb[16].mxu1 %vm79_vm0, %v66_v0 }
  0x35   :  { %1051 = vmatprep.mubr.msk.f32.mxu0 %vm79_vm0, %v41_v1  ;;  %1090 = vmatprep.mubr.msk.f32.mxu1 %vm79_vm0, %v67_v2 }
  0x36   :  { %718 = vperm.xlu1 %1176, %v660_v18   ;;  %713 = vperm.xlu0 %1175, %v659_v19  }
  0x38   :  { %1052 = vmatmul.mubr.msk.f32.gmra.mrb[18].mxu0 %vm79_vm0, %v42_v5  ;;  %1091 = vmatmul.mubr.msk.f32.gmra.mrb[18].mxu1 %vm79_vm0, %v68_v6 }
  0x39   :  { %1054 = vmatprep.mubr.msk.f32.mxu0 %vm79_vm0, %v43_v7  ;;  %1093 = vmatprep.mubr.msk.f32.mxu1 %vm79_vm0, %v69_v8 }
  0x3a   :  { %760 = vperm.xlu1 %1176, %v750_v21   ;;  %755 = vperm.xlu0 %1175, %v749_v22  }
  0x3c   :  { %1055 = vmatmul.mubr.msk.f32.gmra.mrb[20].mxu0 %vm79_vm0, %v44_v11  ;;  %1094 = vmatmul.mubr.msk.f32.gmra.mrb[20].mxu1 %vm79_vm0, %v70_v12 }
  0x3d   :  { %1057 = vmatprep.mubr.msk.f32.mxu0 %vm79_vm0, %v45_v13  ;;  %1120 = vmatprep.mubr.msk.f32.mxu1 %vm773_vm1, %v745_v25 }
  0x3e   :  { %770 = vperm.xlu1 %1176, %v752_v23   ;;  %765 = vperm.xlu0 %1175, %v751_v24  }
  0x40   :  { %1058 = vmatmul.mubr.msk.f32.gmra.mrb[22].mxu0 %vm79_vm0, %v46_v16 }
  0x41   :  { %1060 = vmatprep.mubr.msk.f32.mxu0 %vm79_vm0, %v47_v17 }
  0x44   :  { %1061 = vmatmul.mubr.msk.f32.gmra.mrb[24].mxu0 %vm79_vm0, %v48_v20 }
  0x87   :  { %v1517_v26 = vpop.permute.xlu1 %663  ;;  %v1519_v27 = vpop.permute.xlu0 %579 }
  0x8b   :  { %v1521_v28 = vpop.permute.xlu1 %668  ;;  %v1523_v29 = vpop.permute.xlu0 %584 }
  0x8f   :  { %v595_v30 = vpop.permute.xlu1 %594  ;;  %v590_v31 = vpop.permute.xlu0 %589 }
  0x95   :  { %v1525_v32 = vpop.permute.xlu1 %678  ;;  %v1527_v33 = vpop.permute.xlu0 %673 }
  0x99   :  { %v1529_v34 = vpop.permute.xlu1 %604  ;;  %v1531_v35 = vpop.permute.xlu0 %599 }
  0x9d   :  { %v1537_v44 = vpop.permute.xlu1 %688  ;;  %v1539_v45 = vpop.permute.xlu0 %683 }
  0xa1   :  { %v1553_v54 = vpop.permute.xlu1 %614  ;;  %v1555_v55 = vpop.permute.xlu0 %609 }
  0xa5   :  { %v1573_v0 = vpop.permute.xlu1 %698  ;;  %v1575_v1 = vpop.permute.xlu0 %693 }
  0xa9   :  { %v625_v18 = vpop.permute.xlu1 %624  ;;  %v620_v19 = vpop.permute.xlu0 %619 }
  0xe7   :  { %v1533_v36 = vpop.f32.mrb[0].mxu0  ;;  %v1065_v37 = vpop.f32.mrb[0].mxu1 }
  0xe8   :  { %v1535_v38 = vpop.f32.mrb[1].mxu0  ;;  %v420_v39 = vpop.f32.mrb[1].mxu1 }
  0xeb   :  { %v1029_v40 = vpop.f32.mrb[2].mxu0  ;;  %v1068_v41 = vpop.f32.mrb[2].mxu1 }
  0xec   :  { %v300_v42 = vpop.f32.mrb[3].mxu0  ;;  %v430_v43 = vpop.f32.mrb[3].mxu1 }
  0xef   :  { %v1032_v46 = vpop.f32.mrb[4].mxu0  ;;  %v1541_v47 = vpop.f32.mrb[4].mxu1 }
  0xf0   :  { %v310_v48 = vpop.f32.mrb[5].mxu0  ;;  %v1543_v49 = vpop.f32.mrb[5].mxu1 }
  0xf3   :  { %v1545_v50 = vpop.f32.mrb[6].mxu0  ;;  %v1547_v51 = vpop.f32.mrb[6].mxu1 }
  0xf4   :  { %v1549_v52 = vpop.f32.mrb[7].mxu0  ;;  %v1551_v53 = vpop.f32.mrb[7].mxu1 }
  0xf7   :  { %v1557_v56 = vpop.f32.mrb[8].mxu0  ;;  %v1559_v57 = vpop.f32.mrb[8].mxu1 }
  0xf8   :  { %v1561_v58 = vpop.f32.mrb[9].mxu0  ;;  %v1563_v59 = vpop.f32.mrb[9].mxu1 }
  0xfb   :  { %v1565_v60 = vpop.f32.mrb[10].mxu0  ;;  %v1567_v61 = vpop.f32.mrb[10].mxu1 }
  0xfc   :  { %v1569_v62 = vpop.f32.mrb[11].mxu0  ;;  %v1571_v63 = vpop.f32.mrb[11].mxu1 }
  0xff   :  { %v1577_v2 = vpop.f32.mrb[12].mxu0  ;;  %v1083_v3 = vpop.f32.mrb[12].mxu1 }
 0x100   :  { %v530_v4 = vmax.f32 %v1533_v36, %v1577_v2  ;;  %v1581_v5 = vpop.f32.mrb[13].mxu0  ;;  %v544_v6 = vmax.f32 %v1065_v37, %v1083_v3  ;;  %v480_v7 = vpop.f32.mrb[13].mxu1 }
 0x101   :  { %v543_v9 = vmax.f32 %v420_v39, %v480_v7 }
 0x103   :  { %v1047_v10 = vpop.f32.mrb[14].mxu0  ;;  %v1086_v11 = vpop.f32.mrb[14].mxu1 }
 0x104   :  { %v532_v12 = vmax.f32 %v1029_v40, %v1047_v10  ;;  %v360_v13 = vpop.f32.mrb[15].mxu0  ;;  %v546_v14 = vmax.f32 %v1068_v41, %v1086_v11  ;;  %v490_v15 = vpop.f32.mrb[15].mxu1 }
 0x105   :  { %v531_v16 = vmax.f32 %v300_v42, %v360_v13  ;;  %v545_v17 = vmax.f32 %v430_v43, %v490_v15 }
 0x106   :  { %v556_v20 = vmax.f32 %v532_v12, %v544_v6 }
 0x107   :  { %v555_v21 = vmax.f32 %v531_v16, %v543_v9  ;;  %v1050_v22 = vpop.f32.mrb[16].mxu0  ;;  %v1089_v23 = vpop.f32.mrb[16].mxu1 }
 0x108   :  { %v640_v24 = vmul.f32 %v595_v30, %v556_v20  ;;  %v534_v25 = vmax.f32 %v1032_v46, %v1050_v22  ;;  %v370_v37 = vpop.f32.mrb[17].mxu0  ;;  %v548_v3 = vmax.f32 %v1541_v47, %v1089_v23  ;;  %v500_v39 = vpop.f32.mrb[17].mxu1 }
 0x109   :  { %v639_v7 = vmul.f32 %v590_v31, %v555_v21  ;;  %v533_v8 = vmax.f32 %v310_v48, %v370_v37  ;;  %v547_v40 = vmax.f32 %v1543_v49, %v500_v39  ;;  %v709_v48 = vpop.permute.xlu1 %708 }
 0x10a   :  { %v558_v41 = vmax.f32 %v534_v25, %v546_v14  ;;  %v724_v42 = vadd.f32 %v1525_v32, %v640_v24  ;;  %v704_v14 = vpop.permute.xlu0 %703 }
 0x10b   :  { %v557_v43 = vmax.f32 %v533_v8, %v545_v17  ;;  %v1053_v10 = vpop.f32.mrb[18].mxu0  ;;  %v1092_v11 = vpop.f32.mrb[18].mxu1  ;;  %v723_v6 = vadd.f32 %v1527_v33, %v639_v7 }
 0x10c   :  { %v642_v9 = vmul.f32 %v1529_v34, %v558_v41  ;;  %v536_v30 = vmax.f32 %v1545_v50, %v1053_v10  ;;  %v380_v46 = vpop.f32.mrb[19].mxu0  ;;  %v550_v47 = vmax.f32 %v1547_v51, %v1092_v11  ;;  %v510_v12 = vpop.f32.mrb[19].mxu1  ;;  %v736_v31 = vmax.f32 %v724_v42, 0.0 }
 0x10d   :  { %v641_v49 = vmul.f32 %v1531_v35, %v557_v43  ;;  %v535_v13 = vmax.f32 %v1549_v52, %v380_v46  ;;  %v549_v32 = vmax.f32 %v1551_v53, %v510_v12  ;;  %v735_v8 = vmax.f32 %v723_v6, 0.0 }
 0x10e   :  { %v560_v15 = vmax.f32 %v536_v30, %v548_v3  ;;  %v726_v33 = vadd.f32 %v1537_v44, %v642_v9 }
 0x10f   :  { %v559_v34 = vmax.f32 %v535_v13, %v547_v40  ;;  %v1056_v16 = vpop.f32.mrb[20].mxu0  ;;  %v1095_v50 = vpop.f32.mrb[20].mxu1  ;;  %v1146_v17 = vpack.c.bf16 %v736_v31, %v735_v8  ;;  %v725_v51 = vadd.f32 %v1539_v45, %v641_v49  ;;  %v1650_v13 = vmax.f32 %v1535_v38, %v1581_v5 }
 0x110   :  { %v644_v20 = vmul.f32 %v1553_v54, %v560_v15  ;;  %v538_v21 = vmax.f32 %v1557_v56, %v1056_v16  ;;  %v390_v35 = vpop.f32.mrb[21].mxu0  ;;  %v552_v52 = vmax.f32 %v1559_v57, %v1095_v50  ;;  %v520_v22 = vpop.f32.mrb[21].mxu1  ;;  %v738_v53 = vmax.f32 %v726_v33, 0.0 }
 0x111   :  { %v643_v23 = vmul.f32 %v1555_v55, %v559_v34  ;;  %v537_v24 = vmax.f32 %v1561_v58, %v390_v35  ;;  %v551_v44 = vmax.f32 %v1563_v59, %v520_v22  ;;  %v737_v25 = vmax.f32 %v725_v51, 0.0  ;;  %v635_v45 = vpop.permute.xlu1 %634  ;;  %v630_v40 = vpop.permute.xlu0 %629 }
 0x112   :  { %v562_v37 = vmax.f32 %v538_v21, %v550_v47  ;;  %v728_v3 = vadd.f32 %v1573_v0, %v644_v20 }
 0x113   :  { %v561_v39 = vmax.f32 %v537_v24, %v549_v32  ;;  %v1059_v54 = vpop.f32.mrb[22].mxu0  ;;  %v1150_v7 = vpack.c.bf16 %v738_v53, %v737_v25  ;;  %v727_v56 = vadd.f32 %v1575_v1, %v643_v23 }
 0x114   :  { %v646_v57 = vmul.f32 %v625_v18, %v562_v37  ;;  %v540_v41 = vmax.f32 %v1565_v60, %v1059_v54  ;;  %v400_v42 = vpop.f32.mrb[23].mxu0  ;;  %v740_v55 = vmax.f32 %v728_v3, 0.0 }
 0x115   :  { %v645_v43 = vmul.f32 %v620_v19, %v561_v39  ;;  %v539_v58 = vmax.f32 %v1569_v62, %v400_v42  ;;  %v739_v59 = vmax.f32 %v727_v56, 0.0  ;;  %v719_v18 = vpop.permute.xlu1 %718  ;;  %v714_v19 = vpop.permute.xlu0 %713 }
 0x116   :  { %v564_v10 = vmax.f32 %v540_v41, %v552_v52  ;;  %v730_v11 = vadd.f32 %v709_v48, %v646_v57 }
 0x117   :  { %v563_v6 = vmax.f32 %v539_v58, %v551_v44  ;;  %v1062_v0 = vpop.f32.mrb[24].mxu0  ;;  %v1154_v9 = vpack.c.bf16 %v740_v55, %v739_v59  ;;  %v729_v30 = vadd.f32 %v704_v14, %v645_v43 }
 0x118   :  { %v648_v46 = vmul.f32 %v635_v45, %v564_v10  ;;  %v542_v47 = vmax.f32 %v1062_v0, %v1567_v61  ;;  %v410_v1 = vpop.f32.mrb[25].mxu0  ;;  %v742_v12 = vmax.f32 %v730_v11, 0.0 }
 0x119   :  { %v647_v31 = vmul.f32 %v630_v40, %v563_v6  ;;  %v541_v60 = vmax.f32 %v410_v1, %v1571_v63  ;;  %v741_v49 = vmax.f32 %v729_v30, 0.0  ;;  %v756_v38 = vpop.permute.xlu0 %755 }
 0x11a   :  { %v554_v62 = vmax.f32 %v530_v4, %v542_v47  ;;  %v732_v48 = vadd.f32 %v719_v18, %v648_v46 }
 0x11b   :  { %v553_v32 = vmax.f32 %v1650_v13, %v541_v60  ;;  %v1158_v8 = vpack.c.bf16 %v742_v12, %v741_v49  ;;  %v731_v14 = vadd.f32 %v714_v19, %v647_v31 }
 0x11c   :  { %v638_v61 = vmul.f32 %v1523_v29, %v554_v62  ;;  %v744_v15 = vmax.f32 %v732_v48, 0.0  ;;  %v761_v29 = vpop.permute.xlu1 %760 }
 0x11d   :  { %v637_v33 = vmul.f32 %v1519_v27, %v553_v32  ;;  %v743_v34 = vmax.f32 %v731_v14, 0.0  ;;  %v747_v27 = vld [vmem:[%s1648_s4 + $0x10] sm:$0xff]  ;;  %v766_v53 = vpop.permute.xlu0 %765 }
 0x11e   :  { %v722_v63 = vadd.f32 %v1521_v28, %v638_v61  ;;  %v748_v28 = vld [vmem:[%s1648_s4 + $0x18] sm:$0xff] }
 0x11f   :  { %v721_v16 = vadd.f32 %v1517_v26, %v637_v33  ;;  %v1162_v50 = vpack.c.bf16 %v744_v15, %v743_v34  ;;  %v746_v26 = vld [vmem:[%s1648_s4 + $0x8] sm:$0xff] }
 0x120   :  { %v734_v36 = vmax.f32 %v722_v63, 0.0  ;;  %v771_v35 = vpop.permute.xlu1 %770 }
 0x121   :  { %v733_v2 = vmax.f32 %v721_v16, 0.0 }
 0x123   :  { %v1142_v4 = vpack.c.bf16 %v734_v36, %v733_v2 }
 0x125   :  { %1143 = vmatprep.subr.bf16.mxu1 %v1142_v4 }
 0x126   :  { %1145 = vmatpush3.bf16.msra.mxu1 %v1142_v4 }
 0x127   :  { %1147 = vmatprep.subr.bf16.mxu1 %v1146_v17 }
 0x12a   :  { %1149 = vmatpush3.bf16.msra.mxu1 %v1146_v17 }
 0x12b   :  { %1151 = vmatprep.subr.bf16.mxu1 %v1150_v7 }
 0x12e   :  { %1153 = vmatpush3.bf16.msra.mxu1 %v1150_v7 }
 0x12f   :  { %1155 = vmatprep.subr.bf16.mxu1 %v1154_v9 }
 0x132   :  { %1157 = vmatpush3.bf16.msra.mxu1 %v1154_v9 }
 0x133   :  { %1159 = vmatprep.subr.bf16.mxu1 %v1158_v8 }
 0x136   :  { %1161 = vmatpush3.bf16.msra.mxu1 %v1158_v8 }
 0x137   :  { %1163 = vmatprep.subr.bf16.mxu1 %v1162_v50 }
 0x13a   :  { %1165 = vmatpush3.bf16.msra.mxu1 %v1162_v50 }
 0x13d   :  { %1121 = vmatmul.mubr.msk.f32.vlgmr.msra.gmra.mrb[22].mxu1 %vm773_vm1, %v746_v26 }
 0x13e   :  { %1123 = vmatprep.mubr.msk.f32.mxu1 %vm773_vm1, %v747_v27 }
 0x141   :  { %1124 = vmatmul.mubr.msk.f32.gmra.mrb[24].mxu1 %vm773_vm1, %v748_v28 }
 0x210   :  { %v1122_v5 = vpop.f32.mrb[22].mxu1 }
 0x211   :  { %v858_v17 = vadd.f32 %v1122_v5, %v761_v29  ;;  %v852_v51 = vpop.f32.mrb[23].mxu1 }
 0x212   :  { %v853_v20 = vadd.f32 %v852_v51, %v756_v38 }
 0x213   :  { %v872_v21 = vmax.f32 %v858_v17, 0.0 }
 0x214   :  { %v871_v52 = vmax.f32 %v853_v20, 0.0  ;;  %v1125_v22 = vpop.f32.mrb[24].mxu1 }
 0x215   :  { %877 = vst.msk [vmem:[%s1649_s6 + $0x8] sm:$0xff] %vm875_vm2, %v872_v21  ;;  %v868_v23 = vadd.f32 %v1125_v22, %v771_v35  ;;  %v862_v24 = vpop.f32.mrb[25].mxu1 }
 0x216   :  { %876 = vst.msk [vmem:[%s1649_s6] sm:$0xff] %vm875_vm2, %v871_v52  ;;  %v863_v44 = vadd.f32 %v862_v24, %v766_v53 }
 0x217   :  { %v874_v25 = vmax.f32 %v868_v23, 0.0 }
 0x218   :  { %v873_v37 = vmax.f32 %v863_v44, 0.0 }
 0x219   :  { %879 = vst.msk [vmem:[%s1649_s6 + $0x18] sm:$0xff] %vm875_vm2, %v874_v25 }
 0x21a   :  { %878 = vst.msk [vmem:[%s1649_s6 + $0x10] sm:$0xff] %vm875_vm2, %v873_v37 }

</bundles_post_ra>
